<compile_context>
chip_gen: v7x
topology: tpu7x:2x2x1
jax: 0.10.0
libtpu: 0.0.40
codegen_flags: <defaults>
</compile_context>

<pallas_src>
import functools

import jax
import jax.numpy as jnp
from jax import lax
from jax.experimental import pallas as pl
from jax.experimental.pallas import tpu as pltpu

EPS = 1e-8                      # torch.nn.CosineSimilarity default eps
VMEM_CAP = 48 * 1024 * 1024     # stay well below v7x's 64 MiB per-TensorCore VMEM


def _round_up(a, b):
    return (a + b - 1) // b * b


def _cosine_sim_kernel(x_ref, y_ref, xnorm_ref, ynorm_ref, o_ref, *, inv_temp):
    # Pairwise dot products on the MXU: contract the last dim of both operands
    # ((tn, D) x (tm, D) -> (tn, tm)); Mosaic handles the RHS transpose in-VMEM (XLU slot).
    dots = lax.dot_general(
        x_ref[...], y_ref[...],
        dimension_numbers=(((1,), (1,)), ((), ())),
        preferred_element_type=jnp.float32,
    )

    # torch.nn.CosineSimilarity clamps the *product* of the norms (documented formula).
    denom = jnp.maximum(xnorm_ref[...] * ynorm_ref[...], EPS)   # (tn,1)*(1,tm) -> (tn,tm)

    # EUP approximate reciprocal + one Newton step: ~f32 precision, no VALU divides.
    inv = pl.reciprocal(denom, approx=True)
    inv = inv * (2.0 - denom * inv)

    o_ref[...] = (dots * (inv * inv_temp)).astype(o_ref.dtype)


def _vmem_estimate(tn, tm, d, in_bytes):
    # Double-buffered input/output tiles + (tn, tm) f32 temporaries + headroom.
    tile_in = tn * d * in_bytes + tm * d * in_bytes + tn * 4 + tm * 4
    tile_out = tn * tm * 4
    temporaries = 3 * tn * tm * 4
    return 2 * (tile_in + tile_out) + temporaries + (1 << 20)


def similarity(x, y, temp, *, row_tile=512, col_tile=256,
               use_bf16_inputs=True, out_dtype=jnp.float32):
    """Pallas equivalent of Similarity(temp)(x, y) for x:(N,1,D), y:(1,M,D) -> (N, M)."""
    assert x.ndim == 3 and y.ndim == 3
    assert x.shape[1] == 1 and y.shape[0] == 1
    assert x.shape[2] == y.shape[2]
    N, _, D = x.shape
    M = y.shape[1]

    in_dtype = jnp.bfloat16 if use_bf16_inputs else jnp.float32
    in_bytes = 2 if use_bf16_inputs else 4

    # --- tile selection (lane/sublane aligned, VMEM capped for v7x) ---
    d_pad = _round_up(D, 128)                       # full-width MXU passes
    tn = min(row_tile, _round_up(N, 8))             # multiple of 8 (sublane)
    tm = min(col_tile, _round_up(M, 128))           # multiple of 128 (lane-dense output)
    while _vmem_estimate(tn, tm, d_pad, in_bytes) > VMEM_CAP:
        if tm > 128:
            tm //= 2
        elif tn > 8:
            tn = max(8, (tn // 2) // 8 * 8)
        else:
            break  # TODO(synk): for huge D add a K-tiled grid axis with a VMEM accumulator.
    n_pad = _round_up(N, tn)
    m_pad = _round_up(M, tm)

    # --- one-time HBM-side prep (hoisted out of the grid loop) ---
    x2 = x.reshape(N, D).astype(jnp.float32)
    y2 = y.reshape(M, D).astype(jnp.float32)
    if n_pad != N or d_pad != D:
        x2 = jnp.pad(x2, ((0, n_pad - N), (0, d_pad - D)))
    if m_pad != M or d_pad != D:
        y2 = jnp.pad(y2, ((0, m_pad - M), (0, d_pad - D)))

    # Norms precomputed once in f32 (padding rows/cols are all-zero -> norm 0,
    # denom clamps to eps, result 0, sliced off at the end).
    x_norm = jnp.sqrt(jnp.sum(x2 * x2, axis=-1, keepdims=True))     # (n_pad, 1)
    y_norm = jnp.sqrt(jnp.sum(y2 * y2, axis=-1))[None, :]           # (1, m_pad)

    x2 = x2.astype(in_dtype)
    y2 = y2.astype(in_dtype)

    # NOTE: requires a concrete Python `temp` (as in the nn.Module ctor), not a traced value.
    kernel = functools.partial(_cosine_sim_kernel, inv_temp=float(1.0 / temp))

    vmem_limit = int(min(max(_vmem_estimate(tn, tm, d_pad, in_bytes),
                             32 * 1024 * 1024), VMEM_CAP))

    out = pl.pallas_call(
        kernel,
        out_shape=jax.ShapeDtypeStruct((n_pad, m_pad), out_dtype),
        grid_spec=pltpu.PrefetchScalarGridSpec(
            num_scalar_prefetch=0,
            grid=(n_pad // tn, m_pad // tm),
            in_specs=[
                pl.BlockSpec((tn, d_pad), lambda i, j: (i, 0)),   # x rows (resident along j)
                pl.BlockSpec((tm, d_pad), lambda i, j: (j, 0)),   # y rows (streamed)
                pl.BlockSpec((tn, 1), lambda i, j: (i, 0)),       # precomputed ||x|| per row
                pl.BlockSpec((1, tm), lambda i, j: (0, j)),       # precomputed ||y|| per column
            ],
            out_specs=pl.BlockSpec((tn, tm), lambda i, j: (i, j)),
        ),
        compiler_params=pltpu.CompilerParams(
            dimension_semantics=("parallel", "parallel"),
            vmem_limit_bytes=vmem_limit,
        ),
    )(x2, y2, x_norm, y_norm)

    return out[:N, :M]


def _reference(x, y, temp):
    # Pure-JAX reference matching torch.nn.CosineSimilarity(dim=-1) semantics.
    dots = jnp.sum(x * y, axis=-1)
    nx = jnp.linalg.norm(x, axis=-1)
    ny = jnp.linalg.norm(y, axis=-1)
    return dots / jnp.maximum(nx * ny, EPS) / temp


if __name__ == "__main__":
    key = jax.random.PRNGKey(0)
    kx, ky = jax.random.split(key)

    N, M, D = 16, 16, 32
    temp = 0.05  # typical SimCSE temperature

    x = jax.random.normal(kx, (N, 1, D), dtype=jnp.float32)
    y = jax.random.normal(ky, (1, M, D), dtype=jnp.float32)

    ref = _reference(x, y, temp)

    # Default (bf16 matmul inputs, f32 norms): looser tolerance from bf16 rounding of the dots.
    out_bf16 = jax.block_until_ready(similarity(x, y, temp))
    assert out_bf16.shape == (N, M)
    assert jnp.allclose(out_bf16, ref, atol=1e-1, rtol=5e-2), "bf16 path mismatch vs reference"

    # Full-precision path: tight tolerance.
    out_f32 = jax.block_until_ready(similarity(x, y, temp, use_bf16_inputs=False))
    assert jnp.allclose(out_f32, ref, atol=1e-3, rtol=1e-3), "f32 path mismatch vs reference"

    print("KERNEL_OK")
</pallas_src>

<mosaic_0001>
module attributes {stable_mosaic.version = 11 : i64} {
  func.func @_cosine_sim_kernel(%arg0: i32, %arg1: i32, %arg2: memref<16x128xbf16, #tpu.memory_space<vmem>>, %arg3: memref<128x128xbf16, #tpu.memory_space<vmem>>, %arg4: memref<16x1xf32, #tpu.memory_space<vmem>>, %arg5: memref<1x128xf32, #tpu.memory_space<vmem>>, %arg6: memref<16x128xf32, #tpu.memory_space<vmem>>) attributes {dimension_semantics = [#tpu.dimension_semantics<parallel>, #tpu.dimension_semantics<parallel>], iteration_bounds = array<i64: 1, 1>, scalar_prefetch = 0 : i64, scratch_operands = 0 : i64, tpu.core_type = #tpu.core_type<tc>, window_params = [{transform_indices = @transform_0, window_bounds = array<i64: 16, 128>}, {transform_indices = @transform_1, window_bounds = array<i64: 128, 128>}, {transform_indices = @transform_2, window_bounds = array<i64: 16, 1>}, {transform_indices = @transform_3, window_bounds = array<i64: 1, 128>}, {transform_indices = @transform_4, window_bounds = array<i64: 16, 128>}]} {
    %c0 = arith.constant 0 : index
    %c0_0 = arith.constant 0 : index
    %0 = vector.load %arg2[%c0, %c0_0] : memref<16x128xbf16, #tpu.memory_space<vmem>>, vector<16x128xbf16>
    %c0_1 = arith.constant 0 : index
    %c0_2 = arith.constant 0 : index
    %1 = vector.load %arg3[%c0_1, %c0_2] : memref<128x128xbf16, #tpu.memory_space<vmem>>, vector<128x128xbf16>
    %cst = arith.constant dense<0.000000e+00> : vector<16x128xf32>
    %2 = tpu.matmul %0, %1, %cst {dimension_numbers = #tpu.dot_dimension_numbers<[1], [1], [0], [0], [0, 0, 1, 0], [], []>} : vector<16x128xbf16>, vector<128x128xbf16>, vector<16x128xf32> -> vector<16x128xf32>
    %c0_3 = arith.constant 0 : index
    %c0_4 = arith.constant 0 : index
    %3 = vector.load %arg4[%c0_3, %c0_4] : memref<16x1xf32, #tpu.memory_space<vmem>>, vector<16x1xf32>
    %c0_5 = arith.constant 0 : index
    %c0_6 = arith.constant 0 : index
    %4 = vector.load %arg5[%c0_5, %c0_6] : memref<1x128xf32, #tpu.memory_space<vmem>>, vector<1x128xf32>
    %5 = vector.broadcast %3 : vector<16x1xf32> to vector<16x128xf32>
    %6 = vector.broadcast %4 : vector<1x128xf32> to vector<16x128xf32>
    %7 = arith.mulf %5, %6 : vector<16x128xf32>
    %cst_7 = arith.constant 9.99999993E-9 : f32
    %8 = vector.broadcast %cst_7 : f32 to vector<16x128xf32>
    %9 = arith.maximumf %7, %8 : vector<16x128xf32>
    %10 = tpu.reciprocal %9 {approx = true} : vector<16x128xf32> -> vector<16x128xf32>
    %11 = arith.mulf %9, %10 : vector<16x128xf32>
    %cst_8 = arith.constant 2.000000e+00 : f32
    %12 = vector.broadcast %cst_8 : f32 to vector<16x128xf32>
    %13 = arith.subf %12, %11 : vector<16x128xf32>
    %14 = arith.mulf %10, %13 : vector<16x128xf32>
    %cst_9 = arith.constant 2.000000e+01 : f32
    %15 = vector.broadcast %cst_9 : f32 to vector<16x128xf32>
    %16 = arith.mulf %14, %15 : vector<16x128xf32>
    %17 = arith.mulf %2, %16 : vector<16x128xf32>
    %c0_10 = arith.constant 0 : index
    %c0_11 = arith.constant 0 : index
    %18 = vector.load %arg6[%c0_10, %c0_11] : memref<16x128xf32, #tpu.memory_space<vmem>>, vector<16x128xf32>
    tpu.vector_store %arg6[%c0_10, %c0_11], %17 {strides = array<i32>} : memref<16x128xf32, #tpu.memory_space<vmem>>, vector<16x128xf32>,
    return
  }
  func.func @transform_0(%arg0: i32, %arg1: i32) -> (i32, i32) {
    %c0_i32 = arith.constant 0 : i32
    %c0_i32_0 = arith.constant 0 : i32
    return %arg0, %c0_i32 : i32, i32
  }
  func.func @transform_1(%arg0: i32, %arg1: i32) -> (i32, i32) {
    %c0_i32 = arith.constant 0 : i32
    %c0_i32_0 = arith.constant 0 : i32
    return %arg1, %c0_i32 : i32, i32
  }
  func.func @transform_2(%arg0: i32, %arg1: i32) -> (i32, i32) {
    %c0_i32 = arith.constant 0 : i32
    %c0_i32_0 = arith.constant 0 : i32
    return %arg0, %c0_i32 : i32, i32
  }
  func.func @transform_3(%arg0: i32, %arg1: i32) -> (i32, i32) {
    %c0_i32 = arith.constant 0 : i32
    %c0_i32_0 = arith.constant 0 : i32
    return %c0_i32, %arg1 : i32, i32
  }
  func.func @transform_4(%arg0: i32, %arg1: i32) -> (i32, i32) {
    %c0_i32 = arith.constant 0 : i32
    return %arg0, %arg1 : i32, i32
  }
}

</mosaic_0001>

<bundles_post_ra>
// kernel: tpu_custom_call.1
= control target key start
LH: loop header
LB: loop body
LE: loop exit
PB: predicated region body
PF: predicated region fallthrough
CT: control target
= control target key end

     0   :  { %9 = vsyncpa [#allocation3], 0  ;;  %s380_s0 = inlined_call_operand.vmem [shape: bf16[16,128], index: 0, kind: input, shape index: {}]   ;;  %s381_s1 = inlined_call_operand.hbm [shape: bf16[128,128], index: 1, kind: input, shape index: {}]   ;;  %s382_s2 = inlined_call_operand.vmem [shape: f32[16,1], index: 2, kind: input, shape index: {}]   ;;  %s383_s3 = inlined_call_operand.vmem [shape: f32[1,128], index: 3, kind: input, shape index: {}]   ;;  %s384_s4 = inlined_call_operand.hbm [shape: f32[16,128], index: 4, kind: output, shape index: {}]  }
   0x1   :  { %10 = vsyncpa [#allocation4], 0  ;;  %s310_s15 = smov [#allocation2]   ;;  %s262_s19 = scalar_lea.hbm %s381_s1, 1024 }
   0x2   :  { %s18_s16 = sshll.u32 %s310_s15, 4  ;;  %p263_p0 = scmp.ne.s32.totalorder %s381_s1, %s262_s19  ;;  %s19_s16 = int_to_ptr.vmem [resolvable:$true] %s18_s16 }
   0x3   :  { %p266_p1 = scmp.lt.u32.totalorder %s262_s19, %s381_s1 }
   0x5   :  { %p268_p2 = pnand %p266_p1, %p263_p0 }
   0x7   :  { %271 = shalt.err (!%p268_p2)
}
   0x8   :  { %s272_s24 = scalar_lea.vmem %s19_s16, 1024  ;;  %p277_p4 = scmp.lt.s32.totalorder %s19_s16, %s19_s16 }
   0x9   :  { %p273_p3 = scmp.ne.s32.totalorder %s19_s16, %s272_s24  ;;  %p278_p5 = scmp.lt.s32.totalorder %s272_s24, %s272_s24 }
   0xb   :  { %p279_p6 = por %p278_p5, %p277_p4 }
   0xd   :  { %p280_p7 = pnand %p279_p6, %p273_p3 }
   0xf   :  { %283 = shalt.err (!%p280_p7)
}
  0x10   :  { %s311_s25 = smov 64   ;;  %s312_s26 = smov 4  }
  0x11   :  { %24 = dma.hbm_to_vmem [thread:$0]  %s381_s1, 1024, %s19_s16, [#allocation3], %s311_s25, %s311_s25, %s312_s26  }
  0x12   :  { %306 = dma.done.wait [#allocation3], 1024  }
  0x13   :  { %307 = vsyncadd [#allocation3], 4294966272  ;;  %v313_v0 = vmov 0.0   ;;  %vm314_vm0 = vmmov 0   ;;  %v315_v1 = vmov 0   ;;  %v249_v2 = vld [vmem:[#allocation2] sm:$0xff]  }
  0x14   :  { %219 = vmatprep.subr.bf16.mxu0 %v313_v0  ;;  %235 = vmatprep.mubr.msk.bf16.mxu0 %vm314_vm0, %v313_v0  ;;  %v250_v3 = vld [vmem:[#allocation2 + $0x8] sm:$0xff]   ;;  %v146_v4 = vld [vmem:[%s382_s2] sm:$0xff]  ;;  %v251_v6 = vld [vmem:[#allocation2 + $0x10] sm:$0xff]  }
  0x15   :  { %248 = vset.pattern.permute.xlu0 %v315_v1  ;;  %220 = vmatpush3.bf16.xpose.msra.mxu0 %v249_v2  ;;  %v147_v5 = vld [vmem:[%s382_s2 + $0x8] sm:$0xff]  ;;  %v252_v7 = vld [vmem:[#allocation2 + $0x18] sm:$0xff]   ;;  %v253_v8 = vld [vmem:[#allocation2 + $0x20] sm:$0xff]  }
  0x16   :  { %221 = vmatprep.subr.bf16.mxu0 %v313_v0  ;;  %151 = vperm.xlu0 %248, %v146_v4   ;;  %v254_v9 = vld [vmem:[#allocation2 + $0x28] sm:$0xff]   ;;  %v255_v10 = vld [vmem:[#allocation2 + $0x30] sm:$0xff]   ;;  %v256_v11 = vld [vmem:[#allocation2 + $0x38] sm:$0xff]  }
  0x17   :  { %v257_v12 = vld [vmem:[%s380_s0] sm:$0xff]   ;;  %s316_s0 = smov [#allocation5]  }
  0x18   :  { %v209_v14 = vld [vmem:[%s383_s3] ss:$0 sm:$0xff]  ;;  %s188_s9 = sshll.u32 %s316_s0, 4  ;;  %s189_s9 = int_to_ptr.vmem [resolvable:$true] %s188_s9 }
  0x19   :  { %s284_s3 = scalar_lea.vmem %s189_s9, 256  ;;  %p289_p9 = scmp.lt.s32.totalorder %s189_s9, %s189_s9 }
  0x1a   :  { %156 = vperm.xlu0 %248, %v147_v5   ;;  %p285_p8 = scmp.ne.s32.totalorder %s189_s9, %s284_s3  ;;  %p290_p10 = scmp.lt.s32.totalorder %s284_s3, %s284_s3 }
  0x1c   :  { %p291_p11 = por %p290_p10, %p289_p9 }
  0x1d   :  { %222 = vmatpush3.bf16.xpose.msra.mxu0 %v250_v3 }
  0x1e   :  { %223 = vmatprep.subr.bf16.mxu0 %v313_v0  ;;  %p292_p12 = pnand %p291_p11, %p285_p8 }
  0x25   :  { %224 = vmatpush3.bf16.xpose.msra.mxu0 %v251_v6 }
  0x26   :  { %225 = vmatprep.subr.bf16.mxu0 %v313_v0 }
  0x2d   :  { %226 = vmatpush3.bf16.xpose.msra.mxu0 %v252_v7 }
  0x2e   :  { %227 = vmatprep.subr.bf16.mxu0 %v313_v0 }
  0x35   :  { %228 = vmatpush3.bf16.xpose.msra.mxu0 %v253_v8 }
  0x36   :  { %229 = vmatprep.subr.bf16.mxu0 %v313_v0 }
  0x3d   :  { %230 = vmatpush3.bf16.xpose.msra.mxu0 %v254_v9 }
  0x3e   :  { %231 = vmatprep.subr.bf16.mxu0 %v313_v0 }
  0x45   :  { %232 = vmatpush3.bf16.xpose.msra.mxu0 %v255_v10 }
  0x46   :  { %233 = vmatprep.subr.bf16.mxu0 %v313_v0 }
  0x4d   :  { %234 = vmatpush3.bf16.xpose.msra.mxu0 %v256_v11 }
  0x54   :  { %236 = vmatmul.mubr.bf16.vlgmr.msra.gmra.mrb[0].mxu0 %v257_v12 }
  0x95   :  { %v152_v13 = vpop.permute.xlu0 %151 }
  0x96   :  { %v165_v16 = vmul.f32 %v209_v14, %v152_v13 }
  0x98   :  { %v167_v18 = vmax.f32 %v165_v16, 1e-08 }
  0x99   :  { %v157_v15 = vpop.permute.xlu0 %156 }
  0x9a   :  { %v166_v17 = vmul.f32 %v209_v14, %v157_v15  ;;  %258 = vrcp.f32 %v167_v18 }
  0x9c   :  { %v168_v19 = vmax.f32 %v166_v17, 1e-08 }
  0x9e   :  { %260 = vrcp.f32 %v168_v19 }
  0xa4   :  { %v259_v20 = vpop.eup %258 }
  0xa5   :  { %v171_v22 = vmul.f32 %v259_v20, %v167_v18 }
  0xa7   :  { %v173_v24 = vsub.f32 2.0, %v171_v22 }
  0xa8   :  { %v261_v21 = vpop.eup %260 }
  0xa9   :  { %v172_v23 = vmul.f32 %v261_v21, %v168_v19  ;;  %v175_v26 = vmul.f32 %v259_v20, %v173_v24 }
  0xab   :  { %v174_v25 = vsub.f32 2.0, %v172_v23  ;;  %v177_v28 = vmul.f32 20.0, %v175_v26 }
  0xad   :  { %v176_v27 = vmul.f32 %v261_v21, %v174_v25 }
  0xaf   :  { %v178_v32 = vmul.f32 20.0, %v176_v27 }
 0x127   :  { %v139_v29 = vpop.f32.mrb[0].mxu0 }
 0x128   :  { %v179_v30 = vmul.f32 %v177_v28, %v139_v29  ;;  %v237_v31 = vpop.f32.mrb[1].mxu0 }
 0x129   :  { %v142_v33 = vpop.f32.mrb[2].mxu0 }
 0x12a   :  { %181 = vst [vmem:[#allocation5] sm:$0xff] %v179_v30  ;;  %v180_v34 = vmul.f32 %v178_v32, %v142_v33  ;;  %v238_v35 = vpop.f32.mrb[3].mxu0 }
 0x12c   :  { %182 = vst [vmem:[#allocation5 + $0x8] sm:$0xff] %v180_v34 }
 0x12d   :  { %295 = shalt.err (!%p292_p12)
}
 0x12e   :  { %s296_s12 = scalar_lea.hbm %s384_s4, 256 }
 0x12f   :  { %p297_p13 = scmp.ne.s32.totalorder %s384_s4, %s296_s12  ;;  %p300_p0 = scmp.lt.u32.totalorder %s296_s12, %s384_s4 }
 0x131   :  { %p302_p1 = pnand %p300_p0, %p297_p13 }
 0x133   :  { %305 = shalt.err (!%p302_p1)
}
 0x134   :  { %s317_s17 = smov 128   ;;  %s318_s18 = smov 8  }
 0x135   :  { %194 = dma.vmem_to_hbm [thread:$0]  %s189_s9, 256, %s384_s4, [#allocation4], %s317_s17, %s317_s17, %s318_s18  }
 0x136   :  { %308 = dma.done.wait [#allocation4], 256  }
 0x137   :  { %309 = vsyncadd [#allocation4], 4294967040 }
 0x138   :  { %198 = vsyncpa [#allocation3], 1 }
 0x139   :  { %199 = vsyncpa [#allocation4], 1 }

</bundles_post_ra>
